<compile_context>
chip_gen: v6e
topology: v6e:2x2x1
jax: 0.10.0
libtpu: 0.0.40
codegen_flags: <defaults>
</compile_context>

<pallas_src>
import functools

import jax
import jax.numpy as jnp
import numpy as np
from jax import lax
from jax.experimental import pallas as pl
from jax.experimental.pallas import tpu as pltpu


def _round_up(x, m):
    return ((x + m - 1) // m) * m


def _bottleneck_kernel(x_ref, hy_ref, w_hs_ref, w2_ref, w3_ref,
                       b_hs_ref, b2_ref, b3_ref, out_ref,
                       *, tile_l, l_valid, c_neck_p, mxu_dtype):
    """One (batch, L-tile) step, channels-on-sublanes / time-on-lanes layout.

    x_ref  : (C_in, TL)      input tile (already head-stride subsampled, zero L-padded)
    hy_ref : (CN, 2)         head activations at times start-1 / start+TL (0 if invalid)
    out_ref: (C_out, TL)     NCL output tile (no channel padding)
    """
    TL, CN = tile_l, c_neck_p
    t = pl.program_id(1)
    start = t * TL

    x = x_ref[...]                                                     # (C_in, TL)

    # ---- fused: head 1x1 conv + shortcut 1x1 conv (BN scale folded into weights,
    #      shifts added here), one MXU matmul ----
    z = jnp.dot(w_hs_ref[...], x, preferred_element_type=jnp.float32) + b_hs_ref[...]
    y = jnp.maximum(z[:CN, :], 0.0)                                    # head: +ReLU
    sc = z[CN:, :]                                                     # shortcut: BN only

    # ---- zero columns corresponding to conv2's zero padding / L padding ----
    col = lax.broadcasted_iota(jnp.int32, y.shape, 1)
    y = jnp.where(start + col < l_valid, y, 0.0)

    # ---- neck: k=3 'same' conv as ONE matmul (CN, 3CN) @ (3CN, TL) ----
    hy = hy_ref[...]                                                   # (CN, 2)
    y_left = hy[:, 0:1]                                                # time start-1
    y_right = hy[:, 1:2]                                               # time start+TL
    y_prev = jnp.where(col == 0, y_left, pltpu.roll(y, shift=1, axis=1))
    y_next = jnp.where(col == TL - 1, y_right, pltpu.roll(y, shift=TL - 1, axis=1))
    y_cat = jnp.concatenate([y_prev.astype(mxu_dtype), y.astype(mxu_dtype),
                             y_next.astype(mxu_dtype)], axis=0)        # (3*CN, TL)
    y2 = jnp.dot(w2_ref[...], y_cat, preferred_element_type=jnp.float32) + b2_ref[...]
    y2 = jnp.maximum(y2, 0.0)

    # ---- tail: 1x1 conv + BN (no activation), residual add, output ReLU ----
    y3 = jnp.dot(w3_ref[...], y2.astype(mxu_dtype),
                 preferred_element_type=jnp.float32) + b3_ref[...]
    out_ref[...] = jnp.maximum(y3 + sc, 0.0).astype(out_ref.dtype)


def resnet_bottleneck_forward(x_ncl, params, *, subsample_length,
                              compute_dtype=jnp.bfloat16, tile_l=512,
                              out_dtype=None):
    """x_ncl: (B, C_in, L) float32.  Returns (B, C_out, L_out) in `out_dtype`.

    tile_l: time steps per grid step (rounded to a multiple of 128).  512 is a good
            default on v5e/v6e/v7x: per-tile VMEM is a few MB and no longer scales
            with the record length.  Set out_dtype=jnp.bfloat16 to halve output HBM
            writes if the downstream block tolerates it.
    """
    B, C_in, L = x_ncl.shape
    s = int(subsample_length)
    out_dtype = x_ncl.dtype if out_dtype is None else out_dtype

    tw, bn = params["torch"], params["bn"]
    w1_t, w2_t, w3_t, wsc_t = tw["w1"], tw["w2"], tw["w3"], tw["wsc"]
    C_neck = w1_t.shape[0]
    C_out = w3_t.shape[0]
    if w2_t.shape[-1] != 3:
        raise NotImplementedError("kernel implements the canonical filter_length=3 neck conv")

    # ---- input: k=1/stride=s head (and shortcut) only read x[:, :, ::s] ----
    x_sub = x_ncl[:, :, ::s] if s > 1 else x_ncl            # (B, C_in, L_out), NCL
    L_out = x_sub.shape[-1]

    TL = min(_round_up(max(int(tile_l), 128), 128), _round_up(L_out, 128))
    T = -(-L_out // TL)
    L_pad = T * TL
    x_p = jnp.pad(x_sub, ((0, 0), (0, 0), (0, L_pad - L_out))).astype(compute_dtype)

    # ---- fold BN scale into conv weights; pad channels only to sublane multiples ----
    CN = _round_up(C_neck, 8)
    # NOTE(v6e/v7x): CN/C_out around 128 fill only half the 256-wide MXU; pad to 256
    # only for large-channel, compute-bound configs (small ECG configs are HBM-bound).
    w1 = w1_t[:, :, 0] * bn["s1"][:, None]                   # (Cneck, Cin)
    wsc = wsc_t[:, :, 0] * bn["ssc"][:, None]                # (Cout, Cin)
    w2 = w2_t * bn["s2"][:, None, None]                      # (Cneck, Cneck, 3)
    w3 = w3_t[:, :, 0] * bn["s3"][:, None]                   # (Cout, Cneck)

    def pad_rows(a, r):
        return jnp.pad(a, ((0, r - a.shape[0]), (0, 0)))

    def pad_cols(a, c):
        return jnp.pad(a, ((0, 0), (0, c - a.shape[1])))

    w_hs = jnp.concatenate([pad_rows(w1, CN), wsc], axis=0).astype(compute_dtype)   # (CN+Cout, Cin)
    w2_taps = [pad_cols(pad_rows(w2[:, :, k], CN), CN) for k in range(3)]
    w2_cat = jnp.concatenate(w2_taps, axis=1).astype(compute_dtype)                 # (CN, 3*CN)
    w3_p = pad_cols(w3, CN).astype(compute_dtype)                                   # (Cout, CN)

    def colvec(v, r):
        v = v.astype(jnp.float32).reshape(-1, 1)
        return jnp.pad(v, ((0, r - v.shape[0]), (0, 0)))

    b_hs = jnp.concatenate([colvec(bn["b1"], CN), colvec(bn["bsc"], C_out)], axis=0)  # (CN+Cout, 1)
    b2c = colvec(bn["b2"], CN)
    b3c = colvec(bn["b3"], C_out)

    # ---- per-tile halo activations (head conv output at times start-1 / start+TL),
    #      precomputed on B*T*2 columns so the kernel never needs overlapping tiles ----
    tl_idx = jnp.arange(T, dtype=jnp.int32)
    lidx = jnp.clip(tl_idx * TL - 1, 0, L_pad - 1)
    ridx = jnp.clip((tl_idx + 1) * TL, 0, L_pad - 1)
    xh = jnp.stack([x_p[:, :, lidx], x_p[:, :, ridx]], axis=-1)        # (B, Cin, T, 2)
    w1_q = w_hs[:CN, :]                                                # same quantized weights
    yh = jnp.einsum("oc,bctk->botk", w1_q.astype(jnp.float32), xh.astype(jnp.float32),
                    precision=lax.Precision.HIGHEST)
    yh = jnp.maximum(yh + b_hs[:CN, :].reshape(1, CN, 1, 1), 0.0)
    keep = jnp.stack([tl_idx > 0, (tl_idx + 1) * TL < L_out], axis=-1)  # (T, 2)
    yh = jnp.where(keep.reshape(1, 1, T, 2), yh, 0.0)
    yh = jnp.transpose(yh, (0, 2, 1, 3))                               # (B, T, CN, 2) f32

    def _const_spec(a):
        zeros = (0,) * a.ndim
        return pl.BlockSpec(a.shape, lambda b, t, _z=zeros: _z)

    kernel = functools.partial(_bottleneck_kernel, tile_l=TL, l_valid=L_out,
                               c_neck_p=CN, mxu_dtype=compute_dtype)

    flops = 2 * B * L_pad * (C_in * (CN + C_out) + 3 * CN * CN + CN * C_out)
    bytes_acc = (int(x_p.size) * np.dtype(compute_dtype).itemsize
                 + B * C_out * L_pad * np.dtype(out_dtype).itemsize
                 + (int(w_hs.size) + int(w2_cat.size) + int(w3_p.size))
                 * np.dtype(compute_dtype).itemsize
                 + (int(b_hs.size) + int(b2c.size) + int(b3c.size) + int(yh.size)) * 4)

    out = pl.pallas_call(
        kernel,
        out_shape=jax.ShapeDtypeStruct((B, C_out, L_pad), out_dtype),
        grid_spec=pltpu.PrefetchScalarGridSpec(
            num_scalar_prefetch=0,
            grid=(B, T),
            in_specs=[
                pl.BlockSpec((None, C_in, TL), lambda b, t: (b, 0, t)),   # x streamed per tile
                pl.BlockSpec((None, None, CN, 2), lambda b, t: (b, t, 0, 0)),  # halo y
                _const_spec(w_hs), _const_spec(w2_cat), _const_spec(w3_p),
                _const_spec(b_hs), _const_spec(b2c), _const_spec(b3c),
            ],
            out_specs=pl.BlockSpec((None, C_out, TL), lambda b, t: (b, 0, t)),
        ),
        compiler_params=pltpu.CompilerParams(
            dimension_semantics=("parallel", "arbitrary"),
            vmem_limit_bytes=48 * 1024 * 1024),
        cost_estimate=pl.CostEstimate(flops=int(flops), transcendentals=0,
                                      bytes_accessed=int(bytes_acc)),
    )(x_p, yh, w_hs, w2_cat, w3_p, b_hs, b2c, b3c)

    return out[:, :, :L_out]                                # drop L padding (no transpose)


def init_params(key, in_channels, num_filters, filter_length,
                *, base_width=48, groups=1, expansion=4):
    """Deterministic he-normal conv weights + synthetic folded BN statistics."""
    DEFAULT_BASE_WIDTH = 12 * 4
    neck = int(num_filters * (base_width / DEFAULT_BASE_WIDTH)) * groups
    c_out = num_filters * expansion
    eps = 1e-5
    ks = jax.random.split(key, 8)

    def he(k, shape, fan_in):
        return jax.random.normal(k, shape, jnp.float32) * jnp.sqrt(2.0 / fan_in)

    # PyTorch conv weight layout: (out_ch, in_ch, kernel)
    w1 = he(ks[0], (neck, in_channels, 1), in_channels)
    w2 = he(ks[1], (neck, neck, filter_length), neck * filter_length)
    w3 = he(ks[2], (c_out, neck, 1), neck)
    wsc = he(ks[3], (c_out, in_channels, 1), in_channels)

    def bn_fold(k, c):
        k1, k2, k3, k4 = jax.random.split(k, 4)
        gamma = 1.0 + 0.2 * jax.random.normal(k1, (c,), jnp.float32)
        beta = 0.1 * jax.random.normal(k2, (c,), jnp.float32)
        mean = 0.1 * jax.random.normal(k3, (c,), jnp.float32)
        var = jax.random.uniform(k4, (c,), jnp.float32, minval=0.5, maxval=1.5)
        scale = gamma / jnp.sqrt(var + eps)
        shift = beta - mean * scale
        return scale, shift

    s1, b1 = bn_fold(ks[4], neck)
    s2, b2 = bn_fold(ks[5], neck)
    s3, b3 = bn_fold(ks[6], c_out)
    ssc, bsc = bn_fold(ks[7], c_out)

    return {
        "torch": {"w1": w1, "w2": w2, "w3": w3, "wsc": wsc},
        "bn": {"s1": s1, "b1": b1, "s2": s2, "b2": b2,
               "s3": s3, "b3": b3, "ssc": ssc, "bsc": bsc},
    }


def reference_forward(x, params, *, subsample_length, filter_length,
                      compute_dtype=jnp.float32):
    """Pure-JAX (lax.conv) reference of the PyTorch forward, eval-mode BN.

    compute_dtype=float32: literal module semantics (conv -> BN affine), HIGHEST precision.
    compute_dtype=bfloat16: BN scale folded into the weights before quantization, so
    the quantization points match the Pallas kernel's MXU operands (f32 accumulation).
    """
    t = params["torch"]
    bn = params["bn"]
    dn = ("NCH", "OIH", "NCH")
    s = subsample_length
    pad = (filter_length - 1) // 2
    exact = compute_dtype == jnp.float32
    prec = lax.Precision.HIGHEST if exact else None
    q = lambda a: a.astype(compute_dtype)

    def fold_w(w, scale):
        return w if exact else w * scale.reshape(-1, 1, 1)

    def fold_s(scale):
        return scale if exact else jnp.ones_like(scale)

    def conv(u, w, stride=1, padding="VALID"):
        return lax.conv_general_dilated(
            q(u), q(w), (stride,), padding, dimension_numbers=dn,
            preferred_element_type=jnp.float32, precision=prec)

    def affine(y, scale, shift):
        return y * scale.reshape(1, -1, 1) + shift.reshape(1, -1, 1)

    y = jnp.maximum(affine(conv(x, fold_w(t["w1"], bn["s1"]), stride=s),
                           fold_s(bn["s1"]), bn["b1"]), 0.0)
    y = jnp.maximum(affine(conv(y, fold_w(t["w2"], bn["s2"]), padding=[(pad, pad)]),
                           fold_s(bn["s2"]), bn["b2"]), 0.0)
    y = affine(conv(y, fold_w(t["w3"], bn["s3"])), fold_s(bn["s3"]), bn["b3"])
    sc = affine(conv(x, fold_w(t["wsc"], bn["ssc"]), stride=s),
                fold_s(bn["ssc"]), bn["bsc"])
    return jnp.maximum(y + sc, 0.0)


if __name__ == "__main__":
    key = jax.random.PRNGKey(0)
    k_x, k_p, k_x2, k_p2 = jax.random.split(key, 4)

    # --- case 1: toy shapes consistent with the module's 1D-ECG forward ---
    batch, in_channels, seq_len = 2, 4, 16
    num_filters, filter_length, subsample_length = 8, 3, 2
    # -> neck channels = 8, out channels = num_filters * expansion(4) = 32, L_out = 8
    x = jax.random.normal(k_x, (batch, in_channels, seq_len), jnp.float32)
    params = init_params(k_p, in_channels, num_filters, filter_length)

    # strict all-f32 check against the module-semantics reference
    out_f32 = jax.block_until_ready(resnet_bottleneck_forward(
        x, params, subsample_length=subsample_length, compute_dtype=jnp.float32))
    ref_f32 = jax.block_until_ready(reference_forward(
        x, params, subsample_length=subsample_length, filter_length=filter_length))
    assert out_f32.shape == (batch, num_filters * 4, seq_len // subsample_length), out_f32.shape
    np.testing.assert_allclose(np.asarray(out_f32), np.asarray(ref_f32), rtol=1e-4, atol=1e-4)

    # bf16-MXU perf path (bf16 output), checked against a reference with matching
    # quantization points
    out_bf16 = jax.block_until_ready(resnet_bottleneck_forward(
        x, params, subsample_length=subsample_length,
        compute_dtype=jnp.bfloat16, out_dtype=jnp.bfloat16))
    ref_bf16 = jax.block_until_ready(reference_forward(
        x, params, subsample_length=subsample_length, filter_length=filter_length,
        compute_dtype=jnp.bfloat16))
    np.testing.assert_allclose(np.asarray(out_bf16.astype(jnp.float32)),
                               np.asarray(ref_bf16), rtol=2e-2, atol=2e-2)

    # --- case 2: multi-tile L axis (3 tiles), stride-2 subsample, ragged last tile ---
    batch2, in2, seq2, nf2, ss2 = 2, 6, 600, 8, 2        # L_out=300, TL=128 -> 3 L tiles
    x2 = jax.random.normal(k_x2, (batch2, in2, seq2), jnp.float32)
    params2 = init_params(k_p2, in2, nf2, filter_length)
    out2 = jax.block_until_ready(resnet_bottleneck_forward(
        x2, params2, subsample_length=ss2, compute_dtype=jnp.float32, tile_l=128))
    ref2 = jax.block_until_ready(reference_forward(
        x2, params2, subsample_length=ss2, filter_length=filter_length))
    np.testing.assert_allclose(np.asarray(out2), np.asarray(ref2), rtol=1e-4, atol=1e-4)

    print("KERNEL_OK")
</pallas_src>

<mosaic_0001>
module attributes {stable_mosaic.version = 11 : i64} {
  func.func @_bottleneck_kernel(%arg0: i32, %arg1: i32, %arg2: memref<1x4x128xf32, #tpu.memory_space<vmem>>, %arg3: memref<1x1x8x2xf32, #tpu.memory_space<vmem>>, %arg4: memref<40x4xf32, #tpu.memory_space<vmem>>, %arg5: memref<8x24xf32, #tpu.memory_space<vmem>>, %arg6: memref<32x8xf32, #tpu.memory_space<vmem>>, %arg7: memref<40x1xf32, #tpu.memory_space<vmem>>, %arg8: memref<8x1xf32, #tpu.memory_space<vmem>>, %arg9: memref<32x1xf32, #tpu.memory_space<vmem>>, %arg10: memref<1x32x128xf32, #tpu.memory_space<vmem>>) attributes {dimension_semantics = [#tpu.dimension_semantics<parallel>, #tpu.dimension_semantics<arbitrary>], iteration_bounds = array<i64: 2, 1>, scalar_prefetch = 0 : i64, scratch_operands = 0 : i64, tpu.core_type = #tpu.core_type<tc>, window_params = [{transform_indices = @transform_0, window_bounds = array<i64: 1, 4, 128>}, {transform_indices = @transform_1, window_bounds = array<i64: 1, 1, 8, 2>}, {pipeline_mode = #tpu.pipeline_mode<synchronous>, transform_indices = @transform_2, window_bounds = array<i64: 40, 4>}, {pipeline_mode = #tpu.pipeline_mode<synchronous>, transform_indices = @transform_3, window_bounds = array<i64: 8, 24>}, {pipeline_mode = #tpu.pipeline_mode<synchronous>, transform_indices = @transform_4, window_bounds = array<i64: 32, 8>}, {pipeline_mode = #tpu.pipeline_mode<synchronous>, transform_indices = @transform_5, window_bounds = array<i64: 40, 1>}, {pipeline_mode = #tpu.pipeline_mode<synchronous>, transform_indices = @transform_6, window_bounds = array<i64: 8, 1>}, {pipeline_mode = #tpu.pipeline_mode<synchronous>, transform_indices = @transform_7, window_bounds = array<i64: 32, 1>}, {transform_indices = @transform_8, window_bounds = array<i64: 1, 32, 128>}]} {
    %c128_i32 = arith.constant 128 : i32
    %0 = arith.muli %arg1, %c128_i32 : i32
    %c0 = arith.constant 0 : index
    %c0_0 = arith.constant 0 : index
    %c0_1 = arith.constant 0 : index
    %1 = vector.load %arg2[%c0, %c0_0, %c0_1] : memref<1x4x128xf32, #tpu.memory_space<vmem>>, vector<1x4x128xf32>
    %2 = vector.shape_cast %1 : vector<1x4x128xf32> to vector<4x128xf32>
    %c0_2 = arith.constant 0 : index
    %c0_3 = arith.constant 0 : index
    %3 = vector.load %arg4[%c0_2, %c0_3] : memref<40x4xf32, #tpu.memory_space<vmem>>, vector<40x4xf32>
    %cst = arith.constant dense<0.000000e+00> : vector<40x128xf32>
    %4 = tpu.matmul %3, %2, %cst {dimension_numbers = #tpu.dot_dimension_numbers<[1], [0], [0], [1], [0, 0, 1, 1], [], []>} : vector<40x4xf32>, vector<4x128xf32>, vector<40x128xf32> -> vector<40x128xf32>
    %c0_4 = arith.constant 0 : index
    %c0_5 = arith.constant 0 : index
    %5 = vector.load %arg7[%c0_4, %c0_5] : memref<40x1xf32, #tpu.memory_space<vmem>>, vector<40x1xf32>
    %6 = vector.broadcast %5 : vector<40x1xf32> to vector<40x128xf32>
    %7 = arith.addf %4, %6 : vector<40x128xf32>
    %8 = vector.extract_strided_slice %7 {offsets = [0, 0], sizes = [8, 128], strides = [1, 1]} : vector<40x128xf32> to vector<8x128xf32>
    %cst_6 = arith.constant 0.000000e+00 : f32
    %9 = vector.broadcast %cst_6 : f32 to vector<8x128xf32>
    %10 = arith.maximumf %8, %9 : vector<8x128xf32>
    %11 = vector.extract_strided_slice %7 {offsets = [8, 0], sizes = [32, 128], strides = [1, 1]} : vector<40x128xf32> to vector<32x128xf32>
    %12 = tpu.iota {dimensions = array<i32: 1>} : vector<8x128xi32>
    %13 = vector.broadcast %0 : i32 to vector<8x128xi32>
    %14 = arith.addi %13, %12 : vector<8x128xi32>
    %c8_i32 = arith.constant 8 : i32
    %15 = vector.broadcast %c8_i32 : i32 to vector<8x128xi32>
    %16 = arith.cmpi slt, %14, %15 : vector<8x128xi32>
    %cst_7 = arith.constant 0.000000e+00 : f32
    %17 = vector.broadcast %cst_7 : f32 to vector<8x128xf32>
    %18 = arith.select %16, %10, %17 : vector<8x128xi1>, vector<8x128xf32>
    %c0_8 = arith.constant 0 : index
    %c0_9 = arith.constant 0 : index
    %c0_10 = arith.constant 0 : index
    %c0_11 = arith.constant 0 : index
    %19 = vector.load %arg3[%c0_8, %c0_9, %c0_10, %c0_11] : memref<1x1x8x2xf32, #tpu.memory_space<vmem>>, vector<1x1x8x2xf32>
    %20 = vector.shape_cast %19 : vector<1x1x8x2xf32> to vector<8x2xf32>
    %21 = vector.extract_strided_slice %20 {offsets = [0, 0], sizes = [8, 1], strides = [1, 1]} : vector<8x2xf32> to vector<8x1xf32>
    %22 = vector.extract_strided_slice %20 {offsets = [0, 1], sizes = [8, 1], strides = [1, 1]} : vector<8x2xf32> to vector<8x1xf32>
    %c0_i32 = arith.constant 0 : i32
    %23 = vector.broadcast %c0_i32 : i32 to vector<8x128xi32>
    %24 = arith.cmpi eq, %12, %23 : vector<8x128xi32>
    %c1_i32 = arith.constant 1 : i32
    %25 = tpu.dynamic_rotate %18 by %c1_i32 dim 1 : vector<8x128xf32>, i32 -> vector<8x128xf32>
    %26 = vector.shape_cast %21 : vector<8x1xf32> to vector<8x1xf32>
    %27 = vector.broadcast %26 : vector<8x1xf32> to vector<8x128xf32>
    %28 = arith.select %24, %27, %25 : vector<8x128xi1>, vector<8x128xf32>
    %c127_i32 = arith.constant 127 : i32
    %29 = vector.broadcast %c127_i32 : i32 to vector<8x128xi32>
    %30 = arith.cmpi eq, %12, %29 : vector<8x128xi32>
    %c127_i32_12 = arith.constant 127 : i32
    %31 = tpu.dynamic_rotate %18 by %c127_i32_12 dim 1 : vector<8x128xf32>, i32 -> vector<8x128xf32>
    %32 = vector.shape_cast %22 : vector<8x1xf32> to vector<8x1xf32>
    %33 = vector.broadcast %32 : vector<8x1xf32> to vector<8x128xf32>
    %34 = arith.select %30, %33, %31 : vector<8x128xi1>, vector<8x128xf32>
    %35 = tpu.concatenate %28, %18, %34 in 0 : vector<8x128xf32>, vector<8x128xf32>, vector<8x128xf32> -> vector<24x128xf32>
    %c0_13 = arith.constant 0 : index
    %c0_14 = arith.constant 0 : index
    %36 = vector.load %arg5[%c0_13, %c0_14] : memref<8x24xf32, #tpu.memory_space<vmem>>, vector<8x24xf32>
    %cst_15 = arith.constant dense<0.000000e+00> : vector<8x128xf32>
    %37 = tpu.matmul %36, %35, %cst_15 {dimension_numbers = #tpu.dot_dimension_numbers<[1], [0], [0], [1], [0, 0, 1, 1], [], []>} : vector<8x24xf32>, vector<24x128xf32>, vector<8x128xf32> -> vector<8x128xf32>
    %c0_16 = arith.constant 0 : index
    %c0_17 = arith.constant 0 : index
    %38 = vector.load %arg8[%c0_16, %c0_17] : memref<8x1xf32, #tpu.memory_space<vmem>>, vector<8x1xf32>
    %39 = vector.broadcast %38 : vector<8x1xf32> to vector<8x128xf32>
    %40 = arith.addf %37, %39 : vector<8x128xf32>
    %cst_18 = arith.constant 0.000000e+00 : f32
    %41 = vector.broadcast %cst_18 : f32 to vector<8x128xf32>
    %42 = arith.maximumf %40, %41 : vector<8x128xf32>
    %c0_19 = arith.constant 0 : index
    %c0_20 = arith.constant 0 : index
    %43 = vector.load %arg6[%c0_19, %c0_20] : memref<32x8xf32, #tpu.memory_space<vmem>>, vector<32x8xf32>
    %cst_21 = arith.constant dense<0.000000e+00> : vector<32x128xf32>
    %44 = tpu.matmul %43, %42, %cst_21 {dimension_numbers = #tpu.dot_dimension_numbers<[1], [0], [0], [1], [0, 0, 1, 1], [], []>} : vector<32x8xf32>, vector<8x128xf32>, vector<32x128xf32> -> vector<32x128xf32>
    %c0_22 = arith.constant 0 : index
    %c0_23 = arith.constant 0 : index
    %45 = vector.load %arg9[%c0_22, %c0_23] : memref<32x1xf32, #tpu.memory_space<vmem>>, vector<32x1xf32>
    %46 = vector.broadcast %45 : vector<32x1xf32> to vector<32x128xf32>
    %47 = arith.addf %44, %46 : vector<32x128xf32>
    %48 = arith.addf %47, %11 : vector<32x128xf32>
    %cst_24 = arith.constant 0.000000e+00 : f32
    %49 = vector.broadcast %cst_24 : f32 to vector<32x128xf32>
    %50 = arith.maximumf %48, %49 : vector<32x128xf32>
    %c0_25 = arith.constant 0 : index
    %c0_26 = arith.constant 0 : index
    %c0_27 = arith.constant 0 : index
    %51 = vector.load %arg10[%c0_25, %c0_26, %c0_27] : memref<1x32x128xf32, #tpu.memory_space<vmem>>, vector<1x32x128xf32>
    %52 = vector.shape_cast %51 : vector<1x32x128xf32> to vector<32x128xf32>
    %53 = vector.shape_cast %50 : vector<32x128xf32> to vector<1x32x128xf32>
    tpu.vector_store %arg10[%c0_25, %c0_26, %c0_27], %53 {strides = array<i32>} : memref<1x32x128xf32, #tpu.memory_space<vmem>>, vector<1x32x128xf32>,
    return
  }
  func.func @transform_0(%arg0: i32, %arg1: i32) -> (i32, i32, i32) {
    %c0_i32 = arith.constant 0 : i32
    %c0_i32_0 = arith.constant 0 : i32
    return %arg0, %c0_i32, %arg1 : i32, i32, i32
  }
  func.func @transform_1(%arg0: i32, %arg1: i32) -> (i32, i32, i32, i32) {
    %c0_i32 = arith.constant 0 : i32
    %c0_i32_0 = arith.constant 0 : i32
    %c0_i32_1 = arith.constant 0 : i32
    return %arg0, %arg1, %c0_i32, %c0_i32_0 : i32, i32, i32, i32
  }
  func.func @transform_2(%arg0: i32, %arg1: i32) -> (i32, i32) {
    %c0_i32 = arith.constant 0 : i32
    %c0_i32_0 = arith.constant 0 : i32
    %c0_i32_1 = arith.constant 0 : i32
    return %c0_i32, %c0_i32_0 : i32, i32
  }
  func.func @transform_3(%arg0: i32, %arg1: i32) -> (i32, i32) {
    %c0_i32 = arith.constant 0 : i32
    %c0_i32_0 = arith.constant 0 : i32
    %c0_i32_1 = arith.constant 0 : i32
    return %c0_i32, %c0_i32_0 : i32, i32
  }
  func.func @transform_4(%arg0: i32, %arg1: i32) -> (i32, i32) {
    %c0_i32 = arith.constant 0 : i32
    %c0_i32_0 = arith.constant 0 : i32
    %c0_i32_1 = arith.constant 0 : i32
    return %c0_i32, %c0_i32_0 : i32, i32
  }
  func.func @transform_5(%arg0: i32, %arg1: i32) -> (i32, i32) {
    %c0_i32 = arith.constant 0 : i32
    %c0_i32_0 = arith.constant 0 : i32
    %c0_i32_1 = arith.constant 0 : i32
    return %c0_i32, %c0_i32_0 : i32, i32
  }
  func.func @transform_6(%arg0: i32, %arg1: i32) -> (i32, i32) {
    %c0_i32 = arith.constant 0 : i32
    %c0_i32_0 = arith.constant 0 : i32
    %c0_i32_1 = arith.constant 0 : i32
    return %c0_i32, %c0_i32_0 : i32, i32
  }
  func.func @transform_7(%arg0: i32, %arg1: i32) -> (i32, i32) {
    %c0_i32 = arith.constant 0 : i32
    %c0_i32_0 = arith.constant 0 : i32
    %c0_i32_1 = arith.constant 0 : i32
    return %c0_i32, %c0_i32_0 : i32, i32
  }
  func.func @transform_8(%arg0: i32, %arg1: i32) -> (i32, i32, i32) {
    %c0_i32 = arith.constant 0 : i32
    %c0_i32_0 = arith.constant 0 : i32
    return %arg0, %c0_i32, %arg1 : i32, i32, i32
  }
}

</mosaic_0001>

<bundles_post_ra>
// kernel: tpu_custom_call.1
= control target key start
LH: loop header
LB: loop body
LE: loop exit
PB: predicated region body
PF: predicated region fallthrough
CT: control target
= control target key end

     0   :  { %13 = vsyncpa [#allocation3], 0  ;;  %s1341_s0 = inlined_call_operand.vmem [shape: f32[2,4,128], index: 0, kind: input, shape index: {}]   ;;  %s1342_s1 = inlined_call_operand.vmem [shape: f32[2,1,8,2], index: 1, kind: input, shape index: {}]   ;;  %s1343_s2 = inlined_call_operand.vmem [shape: f32[40,4], index: 2, kind: input, shape index: {}]   ;;  %s1344_s3 = inlined_call_operand.vmem [shape: f32[8,24], index: 3, kind: input, shape index: {}]   ;;  %s1345_s4 = inlined_call_operand.vmem [shape: f32[32,8], index: 4, kind: input, shape index: {}]   ;;  %s1346_s5 = inlined_call_operand.vmem [shape: f32[40,1], index: 5, kind: input, shape index: {}]   ;;  %s1347_s6 = inlined_call_operand.vmem [shape: f32[8,1], index: 6, kind: input, shape index: {}]   ;;  %s1348_s7 = inlined_call_operand.vmem [shape: f32[32,1], index: 7, kind: input, shape index: {}]   ;;  %s1349_s8 = inlined_call_operand.hbm [shape: f32[2,32,128], index: 8, kind: output, shape index: {}]  }
   0x1   :  { %15 = vsyncpa [#allocation3 + $0x1], 0  ;;  %s1125_s27 = smov 0   ;;  %s1127_s28 = smov 0  }
   0x2   :  { %s1129_s29 = smov 0   ;;  %s1131_s30 = smov 0  }
   0x3   :  { %s1133_s9 = smov 0   ;;  %s1135_s10 = smov 0  }
   0x4 LB: > { %s851_s11 = sadd.s32 4294967295, %s1069_s10   ;;  %s852_s12 = sadd.s32 4294967294, %s1069_s10   ;;  %s1069_s10 = sphi %s1135_s10, %s21_s10   ;;  %s1065_s9 = sphi %s1133_s9, %s1356_s9   ;;  %s1061_s30 = sphi %s1131_s30, %s1355_s30   ;;  %s1057_s29 = sphi %s1129_s29, %s1354_s29   ;;  %s1053_s28 = sphi %s1127_s28, %s1353_s28   ;;  %s1049_s27 = sphi %s1125_s27, %s1352_s27  }
   0x5   : > { %s33_s13 = sadd.s32 1, %s1065_s9  ;;  %s224_s14 = sadd.s32 1, %s1057_s29 }
   0x6   : > { %p35_p0 = scmp.ge.s32.totalorder %s33_s13, 2  ;;  %p234_p1 = scmp.ne.s32.totalorder %s1057_s29, %s1053_s28 }
   0x7   : > { %p235_p2 = scmp.eq.s32.totalorder %s851_s11, 1  ;;  %p240_p3 = scmp.ne.s32.totalorder %s1053_s28, %s1049_s27 }
   0x8   : > { %s1358_s13 = smov (%p35_p0, %s33_s13), 0  ;;  %p241_p5 = scmp.eq.s32.totalorder %s852_s12, 1 }
   0x9   : > { %p1165_p4 = por %p235_p2, %p234_p1  ;;  %s219_s16 = ssub.s32 %s1065_s9, %s1358_s13 }
   0xa   : > { %p855_p6 = scmp.ge.s32.totalorder %s1069_s10, 1  ;;  %p222_p7 = scmp.eq.s32.totalorder %s219_s16, 0 }
   0xb   : > { %p1172_p8 = por %p241_p5, %p240_p3  ;;  %p297_p9 = scmp.lt.s32.totalorder %s1069_s10, 3 }
   0xc   : > { %s1178_s18 = scalar_select %p222_p7, %s1057_s29, %s224_s14  }
   0xd   : > { %p298_p10 = pnand %p855_p6, %p297_p9 }
   0xe   : > { %p340_p11 = scmp.lt.s32.totalorder (!%p298_p10), %s1061_s30, 1  ;;  %s1075_s12 = smov (!%p298_p10), 127  }
   0xf   : > { %301 = sbr.rel (%p298_p10) target bundleno = 763 (0x2fb), region = 52  ;;  %s1076_s14 = smov (!%p298_p10), 1  }
  0x14   : > { %v1071_v0 = vmov 0.0   ;;  %vm1072_vm0 = vmmov 0   ;;  %v361_v1 = vld [vmem:[%s1346_s5] sm:$0xff]  ;;  %s341_s21 = scalar_select %p340_p11, %s1061_s30, 1  ;;  %v1073_v2 = vmov 0   ;;  %vm407_vm1 = vcmask 1043456  }
  0x15   : > { %892 = vmatprep.subr.mxu0 %v1071_v0  ;;  %894 = vmatprep.mubr.msk.f32.mxu0 %vm1072_vm0, %v1071_v0  ;;  %v356_v3 = vld [vmem:[%s1343_s2] sm:$0xff]  ;;  %vm391_vm2 = vcmask 31744   ;;  %v1074_v6 = vmov 1   ;;  %v357_v7 = vld [vmem:[%s1343_s2 + $0x8] sm:$0xff]  ;;  %v358_v8 = vld [vmem:[%s1343_s2 + $0x10] sm:$0xff]  ;;  %v502_v11 = vlaneseq  ;;  %vm533_vm6 = vcmask 195584  }
  0x16   : > { %989 = vset.pattern.permute.xlu0 %v1073_v2  ;;  %991 = vset.pattern.permute.xlu1 %v1073_v2  ;;  %s857_s22 = sshll.u32 %s341_s21, 2  ;;  %s858_s23 = sshll.u32 %s341_s21, 3  ;;  %v359_v9 = vld [vmem:[%s1343_s2 + $0x18] sm:$0xff]  ;;  %v360_v10 = vld [vmem:[%s1343_s2 + $0x20] sm:$0xff]  ;;  %v362_v22 = vld [vmem:[%s1346_s5 + $0x8] sm:$0xff]  ;;  %vm636_vm7 = vcmask 64512  }
  0x17   : > { %368 = vperm.xlu0 %989, %v361_v1   ;;  %909 = vmatprep.subr.mxu1 %v1071_v0  ;;  %s346_s26 = scalar_lea.vmem %s1341_s0, %s857_s22  ;;  %s353_s19 = scalar_lea.vmem %s1342_s1, %s858_s23  ;;  %v503_v13 = vand.u32 127, %v502_v11  ;;  %v363_v25 = vld [vmem:[%s1346_s5 + $0x10] sm:$0xff]  ;;  %v365_v28 = vld [vmem:[%s1346_s5 + $0x20] sm:$0xff]  ;;  %v613_v30 = vld [vmem:[%s1348_s7 + $0x8] sm:$0xff] }
  0x18   : > { %915 = vmatprep.mubr.msk.f32.mxu1 %vm1072_vm0, %v1071_v0  ;;  %v355_v4 = vld [vmem:[%s346_s26] sm:$0xf]  ;;  %v615_v32 = vld [vmem:[%s1348_s7 + $0x18] sm:$0xff]  ;;  %v614_v35 = vld [vmem:[%s1348_s7 + $0x10] sm:$0xff]  ;;  %s337_s22 = sand.u32 1, %s1053_s28   ;;  %s876_s26 = sshll.u32 %s1061_s30, 9 }
  0x19   : > { %v508_v5 = vld [vmem:[%s353_s19] sm:$0xff]  ;;  %893 = vmatpush3.msk.msra.mxu0 %vm407_vm1, %v355_v4  ;;  %vm506_vm3 = vcmp.lt.s32.totalorder %v503_v13, 8  ;;  %v364_v33 = vld [vmem:[%s1346_s5 + $0x18] sm:$0xff]  ;;  %vm518_vm4 = vcmp.eq.s32.totalorder %v503_v13, 127  ;;  %vm509_vm5 = vcmp.eq.s32.totalorder %v503_v13, 0  ;;  %v609_v49 = vld [vmem:[%s1345_s4 + $0x8] sm:$0xff] }
  0x1a   : > { %514 = vperm.xlu1 %991, %v508_v5   ;;  %895 = vmatmul.mubr.msk.f32.vlgmr.msra.gmra.mxu0 %vm391_vm2, %v356_v3  ;;  %v527_v31 = vld [vmem:[%s1347_s6] sm:$0xff]  ;;  %v610_v50 = vld [vmem:[%s1345_s4 + $0x10] sm:$0xff]  ;;  %v611_v51 = vld [vmem:[%s1345_s4 + $0x18] sm:$0xff]  ;;  %s856_s23 = sshll.u32 %s337_s22, 5  ;;  %s1296_s16 = scalar_lea.sflag [#allocation3], %s337_s22 }
  0x1b   : > { %990 = vset.pattern.permute.xlu0 %v1074_v6  ;;  %897 = vmatprep.mubr.msk.f32.mxu0 %vm1072_vm0, %v1071_v0  ;;  %v612_v34 = vld [vmem:[%s1348_s7] sm:$0xff]  ;;  %s339_s24 = scalar_lea.vmem [#allocation2], %s856_s23  ;;  %s1077_s19 = smov [#allocation2]  }
  0x1c   : > { %522 = vperm.xlu0 %990, %v508_v5   ;;  %v526_v41 = vld [vmem:[%s1344_s3] sm:$0xff]  ;;  %s761_s25 = sshll.u32 %s339_s24, 4  ;;  %s997_s20 = sshll.u32 %s1077_s19, 4  ;;  %s1287_s25 = int_to_ptr.vmem [resolvable:$true] %s761_s25  ;;  %s998_s20 = int_to_ptr.vmem [resolvable:$false] %s997_s20 }
  0x1d   : > { %v608_v43 = vld [vmem:[%s1345_s4] sm:$0xff]  ;;  %s993_s30 = scalar_lea.vmem %s1287_s25, 512  ;;  %s999_s21 = scalar_lea.vmem %s998_s20, 1024 }
  0x1e   : > { %898 = vmatmul.mubr.msk.f32.gmra.mxu0 %vm391_vm2, %v357_v7  ;;  %p994_p12 = scmp.ne.s32.totalorder %s1287_s25, %s993_s30  ;;  %p1000_p1 = scmp.lt.s32.totalorder %s1287_s25, %s998_s20 }
  0x1f   : > { %900 = vmatprep.mubr.msk.f32.mxu0 %vm1072_vm0, %v1071_v0  ;;  %p1001_p2 = scmp.lt.s32.totalorder %s999_s21, %s993_s30 }
  0x20   : > { %992 = vset.pattern.permute.xlu0 %v1073_v2  ;;  %p995_p13 = pnand %p994_p12, %p1165_p4 }
  0x21   : > { %530 = vperm.xlu0 %992, %v527_v31   ;;  %p1002_p3 = por %p1001_p2, %p1000_p1 }
  0x22   : > { %901 = vmatmul.mubr.msk.f32.gmra.mxu0 %vm391_vm2, %v358_v8  ;;  %p996_p0 = pneg %p995_p13 }
  0x23   : > { %903 = vmatprep.mubr.msk.f32.mxu0 %vm1072_vm0, %v1071_v0 }
  0x24   : > { %p1003_p5 = pnand %p1002_p3, %p996_p0 }
  0x25   : > { %383 = vperm.xlu0 %992, %v364_v33  }
  0x26   : > { %904 = vmatmul.mubr.msk.f32.gmra.mxu0 %vm391_vm2, %v359_v9 }
  0x27   : > { %906 = vmatprep.mubr.msk.f32.mxu0 %vm1072_vm0, %v1071_v0 }
  0x29   : > { %618 = vperm.xlu0 %992, %v612_v34  }
  0x2a   : > { %907 = vmatmul.mubr.msk.f32.gmra.mxu0 %vm391_vm2, %v360_v10 }
  0x2d   : > { %628 = vperm.xlu0 %992, %v614_v35  }
  0x92   : > { %v369_v12 = vpop.permute.xlu0 %368 }
  0x95   : > { %v515_v36 = vpop.permute.xlu1 %514 }
  0x97   : > { %v523_v37 = vpop.permute.xlu0 %522 }
  0x9c   : > { %v531_v44 = vpop.permute.xlu0 %530 }
  0xa0   : > { %v384_v55 = vpop.permute.xlu0 %383 }
  0xa4   : > { %v619_v57 = vpop.permute.xlu0 %618 }
  0xa8   : > { %v629_v7 = vpop.permute.xlu0 %628 }
  0xda   : > { %v477_v14 = vpop.f32.mrf.mxu0 }
  0xdb   : > { %v478_v15 = vadd.f32 %v477_v14, %v369_v12 }
  0xdc   : > { %v896_v16 = vpop.f32.mrf.mxu0 }
  0xdd   : > { %v501_v17 = vmax.f32 %v478_v15, 0.0 }
  0xde   : > { %v1225_v18 = vpop.f32.mrf.mxu0 }
  0xdf   : > { %v507_v19 = vsel %vm506_vm3, %v501_v17, 0.0 }
  0xe0   : > { %519 = vrot.lane.b32.xlu1 %v507_v19, %s1075_s12  ;;  %v899_v20 = vpop.f32.mrf.mxu0 }
  0xe2   : > { %v1228_v21 = vpop.f32.mrf.mxu0 }
  0xe4   : > { %510 = vrot.lane.b32.xlu1 %v507_v19, %s1076_s14  ;;  %v902_v23 = vpop.f32.mrf.mxu0  ;;  %s1292_s14 = scalar_lea.hbm %s1349_s8, %s876_s26 }
  0xe6   : > { %v1233_v24 = vpop.f32.mrf.mxu0 }
  0xe7   : > { %v493_v9 = vadd.f32 %v1233_v24, %v384_v55 }
  0xe8   : > { %373 = vperm.xlu1 %991, %v362_v22   ;;  %v905_v26 = vpop.f32.mrf.mxu0 }
  0xea   : > { %v1238_v27 = vpop.f32.mrf.mxu0 }
  0xec   : > { %378 = vperm.xlu1 %991, %v363_v25   ;;  %v908_v29 = vpop.f32.mrf.mxu0 }
  0xf0   : > { %388 = vperm.xlu1 %991, %v365_v28  }
  0xf4   : > { %623 = vperm.xlu1 %991, %v613_v30  }
  0xf8   : > { %633 = vperm.xlu1 %991, %v615_v32  }
 0x152   : > { %v520_v38 = vpop.permute.xlu1 %519 }
 0x153   : > { %v525_v39 = vsel %vm518_vm4, %v523_v37, %v520_v38 }
 0x154   : > { %910 = vmatpush3.msra.mxu1 %v525_v39 }
 0x155   : > { %911 = vmatprep.subr.mxu1 %v1071_v0 }
 0x156   : > { %912 = vmatpush3.msk.msra.mxu1 %vm506_vm3, %v501_v17  ;;  %v511_v40 = vpop.permute.xlu1 %510 }
 0x157   : > { %913 = vmatprep.subr.mxu1 %v1071_v0  ;;  %v517_v42 = vsel %vm509_vm5, %v515_v36, %v511_v40 }
 0x158   : > { %914 = vmatpush3.msra.mxu1 %v517_v42 }
 0x159   : > { %916 = vmatmul.mubr.msk.f32.vlgmr.msra.gmra.mxu1 %vm533_vm6, %v526_v41 }
 0x15a   : > { %920 = vmatprep.mubr.msk.f32.mxu1 %vm636_vm7, %v608_v43 }
 0x163   : > { %v374_v52 = vpop.permute.xlu1 %373 }
 0x164   : > { %v483_v62 = vadd.f32 %v1225_v18, %v374_v52 }
 0x167   : > { %v379_v53 = vpop.permute.xlu1 %378 }
 0x168   : > { %v488_v59 = vadd.f32 %v1228_v21, %v379_v53 }
 0x16b   : > { %v389_v54 = vpop.permute.xlu1 %388 }
 0x16c   : > { %v498_v3 = vadd.f32 %v1238_v27, %v389_v54 }
 0x16f   : > { %v624_v56 = vpop.permute.xlu1 %623 }
 0x173   : > { %v634_v1 = vpop.permute.xlu1 %633 }
 0x219   : > { %v603_v45 = vpop.f32.mrf.mxu1 }
 0x21a   : > { %v604_v46 = vadd.f32 %v603_v45, %v531_v44 }
 0x21b   : > { %v917_v47 = vpop.f32.mrf.mxu1 }
 0x21c   : > { %v607_v48 = vmax.f32 %v604_v46, 0.0 }
 0x21e   : > { %918 = vmatprep.subr.mxu1 %v607_v48 }
 0x21f   : > { %919 = vmatpush3.msra.mxu1 %v607_v48 }
 0x220   : > { %921 = vmatmul.mubr.msk.f32.vlgmr.msra.gmra.mxu1 %vm636_vm7, %v609_v49 }
 0x221   : > { %923 = vmatprep.mubr.msk.f32.mxu1 %vm636_vm7, %v610_v50 }
 0x224   : > { %924 = vmatmul.mubr.msk.f32.gmra.mxu1 %vm636_vm7, %v611_v51 }
 0x2e0   : > { %v922_v58 = vpop.f32.mrf.mxu1 }
 0x2e1   : > { %v721_v60 = vadd.f32 %v922_v58, %v624_v56 }
 0x2e2   : > { %v715_v61 = vpop.f32.mrf.mxu1 }
 0x2e3   : > { %v735_v63 = vadd.f32 %v721_v60, %v488_v59  ;;  %v716_v0 = vadd.f32 %v715_v61, %v619_v57 }
 0x2e4   : > { %v925_v2 = vpop.f32.mrf.mxu1 }
 0x2e5   : > { %v739_v4 = vmax.f32 %v735_v63, 0.0  ;;  %v734_v5 = vadd.f32 %v716_v0, %v483_v62  ;;  %v731_v6 = vadd.f32 %v925_v2, %v634_v1 }
 0x2e6   : > { %v725_v8 = vpop.f32.mrf.mxu1 }
 0x2e7   : > { %743 = vst [vmem:[%s339_s24 + $0x8] sm:$0xff] %v739_v4  ;;  %v738_v10 = vmax.f32 %v734_v5, 0.0  ;;  %v737_v11 = vadd.f32 %v731_v6, %v498_v3  ;;  %v726_v12 = vadd.f32 %v725_v8, %v629_v7 }
 0x2e9   : > { %742 = vst [vmem:[%s339_s24] sm:$0xff] %v738_v10  ;;  %v741_v13 = vmax.f32 %v737_v11, 0.0  ;;  %v736_v14 = vadd.f32 %v726_v12, %v493_v9 }
 0x2eb   : > { %745 = vst [vmem:[%s339_s24 + $0x18] sm:$0xff] %v741_v13  ;;  %v740_v15 = vmax.f32 %v736_v14, 0.0 }
 0x2ed   : > { %744 = vst [vmem:[%s339_s24 + $0x10] sm:$0xff] %v740_v15 }
 0x2ee   : > { %1006 = shalt.err (!%p1003_p5)
}
 0x2ef   : > { %s1007_s22 = scalar_lea.hbm %s1292_s14, 512  ;;  %s1011_s26 = scalar_lea.hbm %s1349_s8, 1024 }
 0x2f0   : > { %p1008_p6 = scmp.ne.s32.totalorder %s1292_s14, %s1007_s22  ;;  %p1012_p10 = scmp.lt.s32.totalorder %s1292_s14, %s1349_s8 }
 0x2f1   : > { %p1013_p11 = scmp.lt.s32.totalorder %s1011_s26, %s1007_s22 }
 0x2f2   : > { %p1009_p7 = pnand %p1008_p6, %p1165_p4 }
 0x2f3   : > { %p1014_p12 = por %p1013_p11, %p1012_p10 }
 0x2f4   : > { %p1010_p9 = pneg %p1009_p7 }
 0x2f6   : > { %p1015_p13 = pnand %p1014_p12, %p1010_p9 }
 0x2f8   : > { %1018 = shalt.err (!%p1015_p13)
}
 0x2f9   : > { %s1078_s30 = smov 128   ;;  %s1079_s19 = smov 8  }
 0x2fa   : > { %926 = dma.vmem_to_hbm [thread:$0]  (%p1165_p4), %s1287_s25, 512, %s1292_s14, %s1296_s16, %s1078_s30, %s1078_s30, %s1079_s19  }
 0x2fb PF: > { %p932_p0 = scmp.ge.s32.totalorder %s1069_s10, 2  ;;  %s776_s20 = sand.u32 1, %s1049_s27  }
 0x2fc   : > { %s777_s21 = scalar_lea.sflag [#allocation3], %s776_s20 }
 0x2fd   : > { %p929_p1 = pnand %p932_p0, %p1172_p8 }
 0x2ff   : > { %p930_p2 = pneg %p929_p1 }
 0x301   : > { %1044 = dma.done.wait (%p930_p2), %s777_s21, 512  }
 0x302   : > { %1046 = vsyncadd (%p930_p2), %s777_s21, 4294966784  ;;  %s21_s10 = sadd.s32 1, %s1069_s10   ;;  %s1352_s27 = smov %s1053_s28 }
 0x303   : > { %p18_p3 = scmp.ge.s32.totalorder %s21_s10, 4   ;;  %s1353_s28 = smov %s1057_s29 }
 0x304   : > { %s1354_s29 = smov %s1178_s18  ;;  %s1355_s30 = smov %s1065_s9 }
 0x305   : > { %s1356_s9 = smov %s1358_s13  ;;  %20 = sbr.rel (!%p18_p3) target bundleno = 4 (0x4), region = 90 }
 0x30a   :  { %782 = vsyncpa [#allocation3], 1 }
 0x30b   :  { %784 = vsyncpa [#allocation3 + $0x1], 1 }

</bundles_post_ra>
